<compile_context>
chip_gen: v7x
topology: tpu7x:2x2x1
jax: 0.10.0
libtpu: 0.0.40
codegen_flags: <defaults>
</compile_context>

<pallas_src>
import jax
import jax.numpy as jnp
from jax.experimental import pallas as pl
from jax.experimental.pallas import tpu as pltpu


def _round_up(x, m):
    return (x + m - 1) // m * m


def _mlp_softmax_kernel(x_ref, w1_ref, b1_ref, w2_ref, b2_ref, o_ref):
    x = x_ref[...]                                               # (TM, inSize) f32

    # layer1: Linear(inSize -> hP).  bf16 MXU operands, f32 accumulation.
    z1 = jnp.dot(x.astype(jnp.bfloat16), w1_ref[...],
                 preferred_element_type=jnp.float32) + b1_ref[...]

    # LeakyReLU (PyTorch default negative_slope = 0.01), f32.
    a1 = jnp.where(z1 >= 0, z1, 0.01 * z1)

    # layer2: Linear(hP -> outP).  Padded output columns carry bias = -1e30 (f32!)
    # so they contribute exactly 0 to the softmax denominator.
    z2 = jnp.dot(a1.astype(jnp.bfloat16), w2_ref[...],
                 preferred_element_type=jnp.float32) + b2_ref[...]

    # Numerically stable softmax over the last dim, all f32.  Exact divide so rows
    # sum to 1 to f32 precision (approx reciprocal was too coarse for parity).
    z2 = z2 - jnp.max(z2, axis=-1, keepdims=True)
    e = jnp.exp(z2)
    probs = e / jnp.sum(e, axis=-1, keepdims=True)

    # Store only the real outSize columns (lane-masked store) — no padded writeback.
    o_ref[...] = probs[:, : o_ref.shape[-1]]


def prepare_params(w1, b1, w2, b2):
    """One-time parameter prep (outside the per-call hot path).

    w1: (h, inSize), b1: (h,), w2: (outSize, h), b2: (outSize,)  (PyTorch layout)
    Returns (w1t, b1r, w2t, b2r): weights transposed to (in, out), padded so the
    hidden/output dims are 128-lane multiples, and stored in bf16 (MXU operands).
    Biases stay f32; padded b2 columns are -1e30 so softmax assigns them exactly 0.
    """
    h, in_size = w1.shape
    out_size = w2.shape[0]
    hp = _round_up(h, 128)
    outp = _round_up(out_size, 128)

    w1t = jnp.zeros((in_size, hp), jnp.bfloat16).at[:, :h].set(w1.T.astype(jnp.bfloat16))
    b1r = jnp.zeros((1, hp), jnp.float32).at[:, :h].set(b1)
    w2t = jnp.zeros((hp, outp), jnp.bfloat16).at[:h, :out_size].set(w2.T.astype(jnp.bfloat16))
    b2r = jnp.full((1, outp), -1e30, jnp.float32).at[:, :out_size].set(b2)
    return w1t, b1r, w2t, b2r


def _vmem_budget_bytes():
    """Generation-aware VMEM budget: ~half of physical VMEM (~64 MiB on v5e/v6e's
    128 MiB, ~32 MiB on v7x's 64 MiB).  Conservative 32 MiB fallback when the
    hardware query is unavailable (e.g. interpret mode)."""
    try:
        get_info = getattr(pltpu, "get_tpu_info", None)
        if get_info is not None:
            phys = getattr(get_info(), "vmem_capacity_bytes", None)
            if phys:
                return int(max(16 * 1024 * 1024, min(phys // 2, 96 * 1024 * 1024)))
    except Exception:
        pass
    return 32 * 1024 * 1024


def _pick_tile_m(n, in_size, hp, outp, out_size, vmem_budget_bytes):
    """Largest batch tile (multiple of 8) such that resident weights, the
    double-buffered streamed x/out tiles, and kernel intermediates fit the budget.
    Also capped so the grid has >= 2 steps (v7x megacore sharding)."""
    n8 = _round_up(max(n, 1), 8)
    # Resident params (default pipeliner double-buffers them): bf16 weights + f32 biases.
    resident = 2 * (2 * (in_size * hp + hp * outp) + 4 * (hp + outp))
    headroom = 2 * 1024 * 1024                       # compiler internal scratch / slack
    cap = max(8, _round_up((n + 1) // 2, 8))         # >= 2 grid steps for 2 TCs on v7x
    for tm in (1024, 512, 256, 128, 64, 32, 16, 8):
        if tm > n8 or tm > cap:
            continue
        streamed = 2 * 4 * tm * (in_size + out_size)              # x + out, 2 bufs each
        interm = tm * (2 * in_size + 2 * hp                       # bf16 casts of x, a1
                       + 4 * (2 * hp + 2 * outp))                 # z1, a1, z2, e in f32
        if resident + streamed + interm + headroom <= vmem_budget_bytes:
            return tm
    return 8


def neuralnet_forward(x, params, *, out_size):
    """Forward pass of NeuralNet.

    x:      (N, inSize) float32
    params: output of prepare_params()
    returns (N, out_size) float32 softmax probabilities
    """
    w1t, b1r, w2t, b2r = params
    n, in_size = x.shape
    hp = w1t.shape[1]
    outp = w2t.shape[1]

    budget = _vmem_budget_bytes()
    tm = _pick_tile_m(n, in_size, hp, outp, out_size, budget)
    grid = (pl.cdiv(n, tm),)

    cost = pl.CostEstimate(
        flops=2 * n * (in_size * hp + hp * outp),
        transcendentals=n * outp,
        bytes_accessed=(4 * n * in_size                      # x (f32)
                        + 2 * (in_size * hp + hp * outp)     # weights (bf16)
                        + 4 * (hp + outp)                    # biases (f32)
                        + 4 * n * out_size),                 # output (f32, unpadded)
    )

    return pl.pallas_call(
        _mlp_softmax_kernel,
        out_shape=jax.ShapeDtypeStruct((n, out_size), jnp.float32),
        grid=grid,
        in_specs=[
            pl.BlockSpec((tm, in_size), lambda i: (i, 0)),   # x: streamed over batch
            pl.BlockSpec((in_size, hp), lambda i: (0, 0)),   # w1 (bf16, VMEM-resident)
            pl.BlockSpec((1, hp), lambda i: (0, 0)),         # b1 (f32)
            pl.BlockSpec((hp, outp), lambda i: (0, 0)),      # w2 (bf16, VMEM-resident)
            pl.BlockSpec((1, outp), lambda i: (0, 0)),       # b2 (f32, -1e30 padding)
        ],
        out_specs=pl.BlockSpec((tm, out_size), lambda i: (i, 0)),
        compiler_params=pltpu.CompilerParams(
            dimension_semantics=("parallel",),               # megacore on v7x
            vmem_limit_bytes=int(budget),                    # match the tiling budget
        ),
        cost_estimate=cost,
    )(x, w1t, b1r, w2t, b2r)


def _torch_linear_init(key, out_features, in_features):
    """Deterministic init matching nn.Linear default: U(-1/sqrt(fan_in), 1/sqrt(fan_in))."""
    kw, kb = jax.random.split(key)
    bound = 1.0 / jnp.sqrt(jnp.float32(in_features))
    w = jax.random.uniform(kw, (out_features, in_features), jnp.float32, -bound, bound)
    b = jax.random.uniform(kb, (out_features,), jnp.float32, -bound, bound)
    return w, b


if __name__ == "__main__":
    # Small shapes consistent with the module: x is (N, inSize), hidden h, outSize classes.
    N, inSize, h, outSize = 16, 32, 64, 8

    key = jax.random.PRNGKey(0)
    kx, k1, k2 = jax.random.split(key, 3)

    x = jax.random.normal(kx, (N, inSize), jnp.float32)
    w1, b1 = _torch_linear_init(k1, h, inSize)
    w2, b2 = _torch_linear_init(k2, outSize, h)

    # One-time param prep (transpose + lane padding + bf16 weights), then jitted forward.
    params = prepare_params(w1, b1, w2, b2)
    fwd = jax.jit(neuralnet_forward, static_argnames=("out_size",))

    y = jax.block_until_ready(fwd(x, params, out_size=outSize))

    # Sanity: shape and exact-division softmax (rows sum to 1 to f32 precision).
    assert y.shape == (N, outSize)
    assert jnp.allclose(jnp.sum(y, axis=-1), 1.0, atol=1e-4)

    # Reference 1: full-f32 PyTorch semantics (loose tol: kernel uses bf16 MXU operands).
    z1 = x @ w1.T + b1
    a1 = jnp.where(z1 >= 0, z1, 0.01 * z1)
    z2 = a1 @ w2.T + b2
    ref = jax.nn.softmax(z2, axis=-1)
    assert jnp.allclose(y, ref, atol=5e-2, rtol=5e-2)

    # Reference 2: same bf16 operand quantization as the kernel (tight tolerance).
    f32 = jnp.float32
    w1q = w1.astype(jnp.bfloat16).astype(f32)
    w2q = w2.astype(jnp.bfloat16).astype(f32)
    xq = x.astype(jnp.bfloat16).astype(f32)
    z1q = xq @ w1q.T + b1
    a1q = jnp.where(z1q >= 0, z1q, 0.01 * z1q).astype(jnp.bfloat16).astype(f32)
    z2q = a1q @ w2q.T + b2
    refq = jax.nn.softmax(z2q, axis=-1)
    assert jnp.allclose(y, refq, atol=5e-3, rtol=5e-3)

    print("KERNEL_OK")
</pallas_src>

<mosaic_0001>
module attributes {stable_mosaic.version = 11 : i64} {
  func.func @_mlp_softmax_kernel(%arg0: i32, %arg1: memref<8x32xf32, #tpu.memory_space<vmem>>, %arg2: memref<32x128xbf16, #tpu.memory_space<vmem>>, %arg3: memref<1x128xf32, #tpu.memory_space<vmem>>, %arg4: memref<128x128xbf16, #tpu.memory_space<vmem>>, %arg5: memref<1x128xf32, #tpu.memory_space<vmem>>, %arg6: memref<8x8xf32, #tpu.memory_space<vmem>>) attributes {dimension_semantics = [#tpu.dimension_semantics<parallel>], iteration_bounds = array<i64: 2>, scalar_prefetch = 0 : i64, scratch_operands = 0 : i64, tpu.core_type = #tpu.core_type<tc>, window_params = [{transform_indices = @transform_0, window_bounds = array<i64: 8, 32>}, {pipeline_mode = #tpu.pipeline_mode<synchronous>, transform_indices = @transform_1, window_bounds = array<i64: 32, 128>}, {pipeline_mode = #tpu.pipeline_mode<synchronous>, transform_indices = @transform_2, window_bounds = array<i64: 1, 128>}, {pipeline_mode = #tpu.pipeline_mode<synchronous>, transform_indices = @transform_3, window_bounds = array<i64: 128, 128>}, {pipeline_mode = #tpu.pipeline_mode<synchronous>, transform_indices = @transform_4, window_bounds = array<i64: 1, 128>}, {transform_indices = @transform_5, window_bounds = array<i64: 8, 8>}]} {
    %c0 = arith.constant 0 : index
    %c0_0 = arith.constant 0 : index
    %0 = vector.load %arg1[%c0, %c0_0] : memref<8x32xf32, #tpu.memory_space<vmem>>, vector<8x32xf32>
    %1 = arith.truncf %0 : vector<8x32xf32> to vector<8x32xbf16>
    %c0_1 = arith.constant 0 : index
    %c0_2 = arith.constant 0 : index
    %2 = vector.load %arg2[%c0_1, %c0_2] : memref<32x128xbf16, #tpu.memory_space<vmem>>, vector<32x128xbf16>
    %cst = arith.constant dense<0.000000e+00> : vector<8x128xf32>
    %3 = tpu.matmul %1, %2, %cst {dimension_numbers = #tpu.dot_dimension_numbers<[1], [0], [0], [1], [0, 0, 1, 1], [], []>} : vector<8x32xbf16>, vector<32x128xbf16>, vector<8x128xf32> -> vector<8x128xf32>
    %c0_3 = arith.constant 0 : index
    %c0_4 = arith.constant 0 : index
    %4 = vector.load %arg3[%c0_3, %c0_4] : memref<1x128xf32, #tpu.memory_space<vmem>>, vector<1x128xf32>
    %5 = vector.broadcast %4 : vector<1x128xf32> to vector<8x128xf32>
    %6 = arith.addf %3, %5 : vector<8x128xf32>
    %cst_5 = arith.constant 0.000000e+00 : f32
    %7 = vector.broadcast %cst_5 : f32 to vector<8x128xf32>
    %8 = arith.cmpf oge, %6, %7 : vector<8x128xf32>
    %cst_6 = arith.constant 0.00999999977 : f32
    %9 = vector.broadcast %cst_6 : f32 to vector<8x128xf32>
    %10 = arith.mulf %9, %6 : vector<8x128xf32>
    %11 = arith.select %8, %6, %10 : vector<8x128xi1>, vector<8x128xf32>
    %12 = arith.truncf %11 : vector<8x128xf32> to vector<8x128xbf16>
    %c0_7 = arith.constant 0 : index
    %c0_8 = arith.constant 0 : index
    %13 = vector.load %arg4[%c0_7, %c0_8] : memref<128x128xbf16, #tpu.memory_space<vmem>>, vector<128x128xbf16>
    %cst_9 = arith.constant dense<0.000000e+00> : vector<8x128xf32>
    %14 = tpu.matmul %12, %13, %cst_9 {dimension_numbers = #tpu.dot_dimension_numbers<[1], [0], [0], [1], [0, 0, 1, 1], [], []>} : vector<8x128xbf16>, vector<128x128xbf16>, vector<8x128xf32> -> vector<8x128xf32>
    %c0_10 = arith.constant 0 : index
    %c0_11 = arith.constant 0 : index
    %15 = vector.load %arg5[%c0_10, %c0_11] : memref<1x128xf32, #tpu.memory_space<vmem>>, vector<1x128xf32>
    %16 = vector.broadcast %15 : vector<1x128xf32> to vector<8x128xf32>
    %17 = arith.addf %14, %16 : vector<8x128xf32>
    %cst_12 = arith.constant dense<0xFF800000> : vector<8xf32>
    %18 = vector.multi_reduction <maximumf>, %17, %cst_12 [1] : vector<8x128xf32> to vector<8xf32>
    %19 = vector.shape_cast %18 : vector<8xf32> to vector<8x1xf32>
    %20 = vector.broadcast %19 : vector<8x1xf32> to vector<8x128xf32>
    %21 = arith.subf %17, %20 : vector<8x128xf32>
    %22 = math.exp %21 : vector<8x128xf32>
    %cst_13 = arith.constant dense<0.000000e+00> : vector<8xf32>
    %23 = vector.multi_reduction <add>, %22, %cst_13 [1] : vector<8x128xf32> to vector<8xf32>
    %24 = vector.shape_cast %23 : vector<8xf32> to vector<8x1xf32>
    %25 = vector.broadcast %24 : vector<8x1xf32> to vector<8x128xf32>
    %26 = arith.divf %22, %25 : vector<8x128xf32>
    %27 = vector.extract_strided_slice %26 {offsets = [0, 0], sizes = [8, 8], strides = [1, 1]} : vector<8x128xf32> to vector<8x8xf32>
    %c0_14 = arith.constant 0 : index
    %c0_15 = arith.constant 0 : index
    %28 = vector.load %arg6[%c0_14, %c0_15] : memref<8x8xf32, #tpu.memory_space<vmem>>, vector<8x8xf32>
    tpu.vector_store %arg6[%c0_14, %c0_15], %27 {strides = array<i32>} : memref<8x8xf32, #tpu.memory_space<vmem>>, vector<8x8xf32>,
    return
  }
  func.func @transform_0(%arg0: i32) -> (i32, i32) {
    %c0_i32 = arith.constant 0 : i32
    %c0_i32_0 = arith.constant 0 : i32
    return %arg0, %c0_i32 : i32, i32
  }
  func.func @transform_1(%arg0: i32) -> (i32, i32) {
    %c0_i32 = arith.constant 0 : i32
    %c0_i32_0 = arith.constant 0 : i32
    %c0_i32_1 = arith.constant 0 : i32
    return %c0_i32, %c0_i32_0 : i32, i32
  }
  func.func @transform_2(%arg0: i32) -> (i32, i32) {
    %c0_i32 = arith.constant 0 : i32
    %c0_i32_0 = arith.constant 0 : i32
    %c0_i32_1 = arith.constant 0 : i32
    return %c0_i32, %c0_i32_0 : i32, i32
  }
  func.func @transform_3(%arg0: i32) -> (i32, i32) {
    %c0_i32 = arith.constant 0 : i32
    %c0_i32_0 = arith.constant 0 : i32
    %c0_i32_1 = arith.constant 0 : i32
    return %c0_i32, %c0_i32_0 : i32, i32
  }
  func.func @transform_4(%arg0: i32) -> (i32, i32) {
    %c0_i32 = arith.constant 0 : i32
    %c0_i32_0 = arith.constant 0 : i32
    %c0_i32_1 = arith.constant 0 : i32
    return %c0_i32, %c0_i32_0 : i32, i32
  }
  func.func @transform_5(%arg0: i32) -> (i32, i32) {
    %c0_i32 = arith.constant 0 : i32
    %c0_i32_0 = arith.constant 0 : i32
    return %arg0, %c0_i32 : i32, i32
  }
}

</mosaic_0001>

<bundles_post_ra>
// kernel: neuralnet_forward.1
= control target key start
LH: loop header
LB: loop body
LE: loop exit
PB: predicated region body
PF: predicated region fallthrough
CT: control target
= control target key end

     0   :  { %10 = vsyncpa [#allocation3], 0  ;;  %s1035_s0 = inlined_call_operand.hbm [shape: f32[16,32], index: 0, kind: input, shape index: {}]   ;;  %s1036_s1 = inlined_call_operand.hbm [shape: bf16[32,128], index: 1, kind: input, shape index: {}]   ;;  %s1037_s2 = inlined_call_operand.vmem [shape: f32[1,128], index: 2, kind: input, shape index: {}]   ;;  %s1038_s3 = inlined_call_operand.hbm [shape: bf16[128,128], index: 3, kind: input, shape index: {}]   ;;  %s1039_s4 = inlined_call_operand.vmem [shape: f32[1,128], index: 4, kind: input, shape index: {}]   ;;  %s1040_s5 = inlined_call_operand.vmem [shape: f32[16,8], index: 5, kind: output, shape index: {}]  }
   0x1   :  { %12 = vsyncpa [#allocation3 + $0x1], 0 }
   0x2   :  { %13 = vsyncpa [#allocation5], 0  ;;  %s857_s18 = smov 0   ;;  %s859_s19 = smov 0  }
   0x3   :  { %s861_s20 = smov 0   ;;  %s863_s21 = smov 0  }
   0x4 LB: > { %s876_s22 = sadd.s32 4294967295, %s818_s21   ;;  %p39_p0 = scmp.ne.s32.totalorder %s810_s19, %s806_s18  ;;  %s818_s21 = sphi %s863_s21, %s1055_s21   ;;  %s814_s20 = sphi %s861_s20, %s1054_s20   ;;  %s810_s19 = sphi %s859_s19, %s1053_s19   ;;  %s806_s18 = sphi %s857_s18, %s1052_s18  }
   0x5   : > { %p1041_p1 = scmp.eq.s32.totalorder %s876_s22, 0  ;;  %p550_p2 = scmp.ge.s32.totalorder %s818_s21, 1 }
   0x6   : > { %p160_p3 = scmp.lt.s32.totalorder %s818_s21, 3  ;;  %s820_s25 = smov [#allocation4]  }
   0x7   : > { %p884_p4 = por %p1041_p1, %p39_p0  ;;  %s172_s26 = sshll.u32 %s820_s25, 4  ;;  %s173_s26 = int_to_ptr.vmem [resolvable:$true] %s172_s26 }
   0x8   : > { %p888_p5 = pnand %p550_p2, %p160_p3  ;;  %s821_s28 = smov [#allocation6]  }
   0x9   : > { %s1044_s23 = scalar_select %p884_p4, 1, 0 }
   0xa   : > { %s1045_s24 = scalar_select %p888_p5, 1, 0 }
   0xb   : > { %p626_p6 = pneg %p888_p5  ;;  %s188_s29 = sshll.u32 %s821_s28, 4  ;;  %s900_s29 = int_to_ptr.vmem [resolvable:$true] %s188_s29 }
   0xc   : > { %s694_s7 = scalar_lea.hbm %s1036_s1, 256 }
   0xd   : > { %p896_p7 = pnand %p626_p6, %p1041_p1  ;;  %p695_p8 = scmp.ne.s32.totalorder %s1036_s1, %s694_s7 }
   0xe   : > { %p701_p12 = scmp.lt.u32.totalorder %s694_s7, %s1036_s1 }
   0xf   : > { %p696_p9 = pneg %p896_p7 }
  0x11   : > { %p697_p10 = pnand %p696_p9, %p695_p8 }
  0x13   : > { %p698_p11 = pneg %p697_p10 }
  0x15   : > { %p703_p13 = pnand %p701_p12, %p698_p11 }
  0x17   : > { %706 = shalt.err (!%p703_p13)
}
  0x18   : > { %s707_s12 = scalar_lea.vmem %s173_s26, 256  ;;  %p715_p6 = scmp.lt.s32.totalorder %s173_s26, %s173_s26 }
  0x19   : > { %p708_p0 = scmp.ne.s32.totalorder %s173_s26, %s707_s12  ;;  %p716_p1 = scmp.lt.s32.totalorder %s707_s12, %s707_s12 }
  0x1b   : > { %p710_p2 = pnand %p708_p0, %p696_p9  ;;  %p717_p4 = por %p716_p1, %p715_p6 }
  0x1d   : > { %p711_p3 = pneg %p710_p2 }
  0x1f   : > { %p718_p5 = pnand %p717_p4, %p711_p3 }
  0x21   : > { %721 = shalt.err (!%p718_p5)
}
  0x22   : > { %s822_s13 = smov 64   ;;  %s823_s14 = smov 4  }
  0x23   : > { %629 = dma.hbm_to_vmem [thread:$0]  (!%p896_p7), %s1036_s1, 256, %s173_s26, [#allocation5], %s822_s13, %s822_s13, %s823_s14  }
  0x24   : > { %s722_s25 = scalar_lea.hbm %s1038_s3, 1024 }
  0x25   : > { %p723_p8 = scmp.ne.s32.totalorder %s1038_s3, %s722_s25  ;;  %p729_p5 = scmp.lt.u32.totalorder %s722_s25, %s1038_s3 }
  0x27   : > { %p725_p1 = pnand %p723_p8, %p696_p9 }
  0x29   : > { %p726_p4 = pneg %p725_p1 }
  0x2b   : > { %p731_p10 = pnand %p729_p5, %p726_p4 }
  0x2d   : > { %734 = shalt.err (!%p731_p10)
}
  0x2e   : > { %s735_s26 = scalar_lea.vmem %s900_s29, 1024  ;;  %p743_p0 = scmp.lt.s32.totalorder %s900_s29, %s900_s29 }
  0x2f   : > { %p736_p11 = scmp.ne.s32.totalorder %s900_s29, %s735_s26  ;;  %p744_p2 = scmp.lt.s32.totalorder %s735_s26, %s735_s26 }
  0x31   : > { %p738_p12 = pnand %p736_p11, %p696_p9  ;;  %p745_p3 = por %p744_p2, %p743_p0 }
  0x33   : > { %p739_p13 = pneg %p738_p12 }
  0x35   : > { %p746_p6 = pnand %p745_p3, %p739_p13 }
  0x37   : > { %749 = shalt.err (!%p746_p6)
}
  0x38   : > { %632 = dma.hbm_to_vmem [thread:$0]  (!%p896_p7), %s1038_s3, 1024, %s900_s29, [#allocation5], %s822_s13, %s822_s13, %s823_s14  }
  0x39   : > { %s950_s10 = sadd.s32 1, %s818_s21   ;;  %s26_s11 = sadd.s32 1, %s814_s20 }
  0x3a   : > { %s23_s27 = ssub.s32 %s818_s21, %s950_s10  ;;  %p33_p9 = scmp.ne.s32.totalorder %s814_s20, %s810_s19 }
  0x3b   : > { %p24_p8 = scmp.eq.s32.totalorder %s23_s27, 0  ;;  %p34_p1 = scmp.eq.s32.totalorder %s818_s21, 0 }
  0x3c   : > { %p639_p4 = scmp.lt.s32.totalorder %s818_s21, 2  ;;  %s205_s12 = sand.u32 1, %s814_s20  }
  0x3d   : > { %s961_s15 = scalar_select %p24_p8, %s814_s20, %s26_s11  }
  0x3e   : > { %p35_p5 = por %p34_p1, %p33_p9  ;;  %s554_s16 = sshll.u32 %s205_s12, 3 }
  0x3f   : > { %s555_s17 = sshll.u32 %s818_s21, 7  ;;  %s209_s29 = scalar_lea.vmem [#allocation2], %s554_s16 }
  0x40   : > { %s967_s28 = scalar_lea.hbm %s1035_s0, %s555_s17  ;;  %s216_s13 = sshll.u32 %s209_s29, 4  ;;  %s973_s13 = int_to_ptr.vmem [resolvable:$true] %s216_s13 }
  0x41   : > { %p969_p7 = pnand %p639_p4, %p35_p5  ;;  %s206_s21 = scalar_lea.sflag [#allocation3], %s205_s12 }
  0x42   : > { %s750_s30 = scalar_lea.hbm %s967_s28, 128  ;;  %s755_s26 = scalar_lea.hbm %s1035_s0, 256 }
  0x43   : > { %p751_p10 = scmp.ne.s32.totalorder %s967_s28, %s750_s30  ;;  %p752_p11 = pneg %p969_p7 }
  0x44   : > { %p756_p0 = scmp.lt.u32.totalorder %s967_s28, %s1035_s0  ;;  %p757_p2 = scmp.lt.u32.totalorder %s755_s26, %s750_s30 }
  0x45   : > { %p753_p12 = pnand %p752_p11, %p751_p10  ;;  %p759_p6 = scmp.lt.u32.totalorder %s750_s30, %s967_s28 }
  0x46   : > { %p758_p3 = por %p757_p2, %p756_p0 }
  0x47   : > { %p754_p13 = pneg %p753_p12 }
  0x48   : > { %p760_p9 = por %p759_p6, %p758_p3 }
  0x4a   : > { %p761_p8 = pnand %p760_p9, %p754_p13 }
  0x4c   : > { %764 = shalt.err (!%p761_p8)
}
  0x4d   : > { %s765_s11 = scalar_lea.vmem %s973_s13, 128  ;;  %s824_s27 = smov [#allocation2]  }
  0x4e   : > { %p766_p1 = scmp.ne.s32.totalorder %s973_s13, %s765_s11  ;;  %s770_s12 = sshll.u32 %s824_s27, 4  ;;  %s771_s12 = int_to_ptr.vmem [resolvable:$false] %s770_s12 }
  0x4f   : > { %s772_s16 = scalar_lea.vmem %s771_s12, 256  ;;  %p773_p10 = scmp.lt.s32.totalorder %s973_s13, %s771_s12 }
  0x50   : > { %p768_p4 = pnand %p766_p1, %p752_p11  ;;  %p774_p12 = scmp.lt.s32.totalorder %s772_s16, %s765_s11 }
  0x52   : > { %p769_p5 = pneg %p768_p4  ;;  %p775_p0 = por %p774_p12, %p773_p10 }
  0x54   : > { %p776_p2 = pnand %p775_p0, %p769_p5 }
  0x56   : > { %779 = shalt.err (!%p776_p2)
}
  0x57   : > { %636 = dma.hbm_to_vmem [thread:$0]  (!%p969_p7), %s967_s28, 128, %s973_s13, %s206_s21  }
  0x58   : > { %p1048_p13 = scmp.ne.s32.totalorder %s1045_s24, 0 }
  0x59   : > { %s227_s17 = sand.u32 (!%p1048_p13), 1, %s810_s19   ;;  %p1049_p11 = scmp.ne.s32.totalorder (!%p1048_p13), %s1044_s23, 0 }
  0x5a   : > { %225 = sbr.rel (%p1048_p13) target bundleno = 857 (0x359), region = 40  ;;  %s557_s18 = sshll.u32 (!%p1048_p13), %s227_s17, 3 }
  0x5b   : > { %s228_s25 = scalar_lea.sflag (!%p1048_p13), [#allocation3], %s227_s17  ;;  %s231_s29 = scalar_lea.vmem (!%p1048_p13), [#allocation2], %s557_s18 }
  0x61   : > { %797 = dma.done.wait (%p1049_p11), %s228_s25, 128  }
  0x62   : > { %799 = vsyncadd (%p1049_p11), %s228_s25, 4294967168  ;;  %p1050_p3 = scmp.eq.s32.totalorder %s876_s22, 0 }
  0x64   : > { %801 = dma.done.wait (%p1050_p3), [#allocation5], 1280   ;;  %p1051_p6 = pmov %p1050_p3 }
  0x65   : > { %v825_v0 = vmov 0.0   ;;  %vm826_vm0 = vmmov 0   ;;  %v680_v1 = vld [vmem:[#allocation4] sm:$0xff]   ;;  %v681_v2 = vld [vmem:[#allocation4 + $0x8] sm:$0xff]   ;;  %v270_v3 = vld [vmem:[%s231_s29] sm:$0xff]  ;;  %vm295_vm1 = vcmask 261120  }
  0x66   : > { %803 = vsyncadd (%p1051_p6), [#allocation5], 4294966016  ;;  %588 = vmatprep.subr.bf16.mxu0 %v825_v0  ;;  %592 = vmatprep.mubr.msk.bf16.mxu0 %vm826_vm0, %v825_v0  ;;  %v682_v4 = vld [vmem:[#allocation6] sm:$0xff]   ;;  %v271_v5 = vpack.c.bf16 %v270_v3, %v270_v3  ;;  %v683_v6 = vld [vmem:[#allocation6 + $0x8] sm:$0xff]   ;;  %p265_p7 = scmp.lt.s32.totalorder %s876_s22, 1  ;;  %vm463_vm3 = vcmask 64512  }
  0x67   : > { %596 = vmatprep.subr.bf16.mxu1 %v825_v0  ;;  %612 = vmatprep.mubr.msk.bf16.mxu1 %vm826_vm0, %v825_v0  ;;  %v684_v7 = vld [vmem:[#allocation6 + $0x10] sm:$0xff]   ;;  %v685_v8 = vld [vmem:[#allocation6 + $0x18] sm:$0xff]   ;;  %v686_v9 = vld [vmem:[#allocation6 + $0x20] sm:$0xff]  }
  0x68   : > { %589 = vmatpush3.bf16.msra.mxu0 %v680_v1  ;;  %597 = vmatpush3.bf16.msra.mxu1 %v682_v4  ;;  %v687_v10 = vld [vmem:[#allocation6 + $0x28] sm:$0xff]   ;;  %v688_v11 = vld [vmem:[#allocation6 + $0x30] sm:$0xff]   ;;  %v689_v12 = vld [vmem:[#allocation6 + $0x38] sm:$0xff]   ;;  %s1057_s22 = smov (!%p265_p7, %s876_s22), 1 }
  0x69   : > { %590 = vmatprep.subr.bf16.mxu0 %v825_v0  ;;  %598 = vmatprep.subr.bf16.mxu1 %v825_v0  ;;  %v561_v13 = vld [vmem:[%s1037_s2] ss:$0 sm:$0xff]  ;;  %s560_s14 = sshll.u32 %s1057_s22, 3 }
  0x6a   : > { %v565_v22 = vld [vmem:[%s1039_s4] ss:$0 sm:$0xff]  ;;  %s268_s6 = scalar_lea.vmem %s1040_s5, %s560_s14 }
  0x6c   : > { %591 = vmatpush3.bf16.msra.mxu0 %v681_v2  ;;  %599 = vmatpush3.bf16.msra.mxu1 %v683_v6 }
  0x6d   : > { %600 = vmatprep.subr.bf16.mxu1 %v825_v0 }
  0x6f   : > { %593 = vmatmul.mubr.msk.bf16.vlgmr.msra.gmra.mrb[0].mxu0 %vm295_vm1, %v271_v5 }
  0x70   : > { %601 = vmatpush3.bf16.msra.mxu1 %v684_v7 }
  0x71   : > { %602 = vmatprep.subr.bf16.mxu1 %v825_v0 }
  0x74   : > { %603 = vmatpush3.bf16.msra.mxu1 %v685_v8 }
  0x75   : > { %604 = vmatprep.subr.bf16.mxu1 %v825_v0 }
  0x78   : > { %605 = vmatpush3.bf16.msra.mxu1 %v686_v9 }
  0x79   : > { %606 = vmatprep.subr.bf16.mxu1 %v825_v0 }
  0x7c   : > { %607 = vmatpush3.bf16.msra.mxu1 %v687_v10 }
  0x7d   : > { %608 = vmatprep.subr.bf16.mxu1 %v825_v0 }
  0x80   : > { %609 = vmatpush3.bf16.msra.mxu1 %v688_v11 }
  0x81   : > { %610 = vmatprep.subr.bf16.mxu1 %v825_v0 }
  0x84   : > { %611 = vmatpush3.bf16.msra.mxu1 %v689_v12 }
 0x142   : > { %v333_v14 = vpop.f32.mrb[0].mxu0 }
 0x143   : > { %v334_v15 = vadd.f32 %v561_v13, %v333_v14  ;;  %v594_v16 = vpop.f32.mrb[1].mxu0 }
 0x144   : > { %v336_v17 = vpop.f32.mrb[2].mxu0 }
 0x145   : > { %vm339_vm2 = vcmp.ge.f32.partialorder %v334_v15, 0.0  ;;  %v340_v18 = vmul.f32 0.01, %v334_v15  ;;  %v595_v19 = vpop.f32.mrb[3].mxu0 }
 0x147   : > { %v341_v20 = vsel %vm339_vm2, %v334_v15, %v340_v18 }
 0x148   : > { %v342_v21 = vpack.c.bf16 %v341_v20, %v341_v20 }
 0x14a   : > { %613 = vmatmul.mubr.bf16.vlgmr.msra.gmra.mrb[0].mxu1 %v342_v21 }
 0x21d   : > { %v448_v23 = vpop.f32.mrb[0].mxu1 }
 0x21e   : > { %v449_v24 = vadd.f32 %v565_v22, %v448_v23  ;;  %v614_v25 = vpop.f32.mrb[1].mxu1 }
 0x21f   : > { %v451_v26 = vpop.f32.mrb[2].mxu1 }
 0x220   : > { %454 = vmax.xlane.f32.xlu0 %v449_v24  ;;  %v615_v27 = vpop.f32.mrb[3].mxu1 }
 0x2ad   : > { %v455_v28 = vpop.xlane.xlu0 %454 }
 0x2ae   : > { %v456_v29 = vsub.f32 %v449_v24, %v455_v28 }
 0x2b0   : > { %v457_v30 = vmul.f32 1.442695, %v456_v29 }
 0x2b2   : > { %690 = vpow2.f32 %v457_v30 }
 0x2bc   : > { %v691_v31 = vpop.eup %690 }
 0x2bd   : > { %459 = vadd.xlane.f32.xlu0 %v691_v31 }
 0x34a   : > { %v460_v32 = vpop.xlane.xlu0 %459 }
 0x34b   : > { %692 = vrcp.f32 %v460_v32 }
 0x355   : > { %v693_v33 = vpop.eup %692 }
 0x356   : > { %v462_v34 = vmul.f32 %v693_v33, %v691_v31 }
 0x358   : > { %464 = vst.msk [vmem:[%s268_s6] sm:$0xff] %vm463_vm3, %v462_v34 }
 0x359 PF: > { %p16_p9 = scmp.ge.s32.totalorder %s950_s10, 4   ;;  %s1052_s18 = smov %s810_s19 }
 0x35a   : > { %s1053_s19 = smov %s814_s20  ;;  %s1054_s20 = smov %s961_s15 }
 0x35b   : > { %s1055_s21 = smov %s950_s10  ;;  %18 = sbr.rel (!%p16_p9) target bundleno = 4 (0x4), region = 88 }
 0x362   :  { %484 = vsyncpa [#allocation3], 1 }
 0x363   :  { %486 = vsyncpa [#allocation3 + $0x1], 1 }
 0x364   :  { %487 = vsyncpa [#allocation5], 1 }

</bundles_post_ra>
